<compile_context>
chip_gen: v6e
topology: v6e:2x2x1
jax: 0.10.0
libtpu: 0.0.40
codegen_flags: <defaults>
</compile_context>

<pallas_src>
import jax
import jax.numpy as jnp
from jax.experimental import pallas as pl
from jax.experimental.pallas import tpu as pltpu


def _copy_kernel(x_ref, o_ref):
    # Pure elementwise passthrough (identity) on one lane-dense tile.
    o_ref[...] = x_ref[...]


def _budgets():
    """Per-generation tile-byte target and explicit scoped-VMEM limit."""
    try:
        vmem = int(pltpu.get_tpu_info().vmem_capacity_bytes)
    except Exception:
        vmem = 64 << 20  # conservative (v7x per-TC physical VMEM)
    # Keep in/out double-buffers (4 x tile) well inside physical VMEM:
    #   v5e/v6e (128 MiB) -> 8 MiB tiles;  v7x (64 MiB) -> 4 MiB tiles.
    tile_bytes = max(1 << 20, min(8 << 20, vmem // 16))
    vmem_limit = min(vmem // 2, max(16 << 20, 8 * tile_bytes))
    return tile_bytes, vmem_limit


def _choose_lanes(total):
    """Widest lane-dense row width (multiple of 128) that evenly divides total."""
    for lanes in (2048, 1024, 512, 256, 128):
        if total % lanes == 0:
            return lanes
    return None


def _pallas_copy_2d(x2d):
    """Tiled, pipelined copy of a lane-dense (rows, lanes) array."""
    rows, lanes = x2d.shape
    itemsize = jnp.dtype(x2d.dtype).itemsize
    # Sublane packing multiple: 8 for 32-bit, 16 for bf16, 32 for int8/bool.
    sub = max(8, 32 // max(1, itemsize))

    tile_bytes, vmem_limit = _budgets()
    target_rows = max(sub, ((tile_bytes // (lanes * itemsize)) // sub) * sub)

    if rows <= target_rows:
        half = rows // 2
        if rows >= 2 * sub and half % sub == 0:
            # >= 2 grid steps so both v7x TensorCores get work (neutral on 1-TC chips).
            tile_rows = half
        else:
            tile_rows = rows  # full-extent block along rows: always legal.
    else:
        tile_rows = target_rows  # multiple of `sub`; partial last block is masked.

    grid = (pl.cdiv(rows, tile_rows),)

    return pl.pallas_call(
        _copy_kernel,
        out_shape=jax.ShapeDtypeStruct((rows, lanes), x2d.dtype),
        grid_spec=pl.GridSpec(
            grid=grid,
            in_specs=[pl.BlockSpec((tile_rows, lanes), lambda i: (i, 0))],
            out_specs=pl.BlockSpec((tile_rows, lanes), lambda i: (i, 0)),
        ),
        compiler_params=pltpu.CompilerParams(
            dimension_semantics=("parallel",),
            vmem_limit_bytes=vmem_limit,
        ),
        cost_estimate=pl.CostEstimate(
            flops=0,
            transcendentals=0,
            bytes_accessed=2 * rows * lanes * itemsize,
        ),
    )(x2d)


def _pallas_copy(x):
    """Materialized identity copy of `x` via the Pallas kernel (benchmark path)."""
    total = x.size
    if total == 0:
        return x

    lanes = _choose_lanes(total)
    if lanes is not None:
        # Zero-copy metadata view: (rows, lanes) with lanes a multiple of 128.
        rows = total // lanes
        out2d = _pallas_copy_2d(x.reshape(rows, lanes))
        return out2d.reshape(x.shape)

    # Unaligned total: copy the 128-aligned prefix with the kernel and pass the
    # tiny (<128 elem) tail straight through (identity), no pad/slice round trip.
    aligned = (total // 128) * 128
    flat = x.reshape(-1)
    if aligned == 0:
        return x
    head = _pallas_copy_2d(flat[:aligned].reshape(aligned // 128, 128))
    return jnp.concatenate([head.reshape(-1), flat[aligned:]]).reshape(x.shape)


def identity_forward(x, *, materialize_copy=False):
    """TestModule.forward(x) -> x.

    Default path returns `x` directly (zero HBM traffic - the correct answer
    for a pure identity).  Set materialize_copy=True to force the tiled,
    lane-dense Pallas copy kernel (for benchmarking / exercising the kernel).
    """
    if not materialize_copy:
        return x
    return _pallas_copy(x)


if __name__ == "__main__":
    key = jax.random.PRNGKey(0)
    # Small NCHW input consistent with a generic module forward.
    x = jax.random.normal(key, (2, 4, 16, 16), dtype=jnp.float32)

    # Production path: pure identity, no copy.
    y_fast = identity_forward(x)
    assert y_fast.shape == x.shape and y_fast.dtype == x.dtype
    assert jnp.array_equal(y_fast, x)

    # Benchmark path: run the Pallas copy kernel once.
    y = identity_forward(x, materialize_copy=True)
    jax.block_until_ready(y)
    assert y.shape == x.shape and y.dtype == x.dtype
    assert jnp.array_equal(y, x)

    print("KERNEL_OK")
</pallas_src>

<mosaic_0001>
module attributes {stable_mosaic.version = 11 : i64} {
  func.func @_copy_kernel(%arg0: i32, %arg1: memref<1x2048xf32, #tpu.memory_space<vmem>>, %arg2: memref<1x2048xf32, #tpu.memory_space<vmem>>) attributes {dimension_semantics = [#tpu.dimension_semantics<parallel>], iteration_bounds = array<i64: 1>, scalar_prefetch = 0 : i64, scratch_operands = 0 : i64, tpu.core_type = #tpu.core_type<tc>, window_params = [{transform_indices = @transform_0, window_bounds = array<i64: 1, 2048>}, {transform_indices = @transform_1, window_bounds = array<i64: 1, 2048>}]} {
    %c0 = arith.constant 0 : index
    %c0_0 = arith.constant 0 : index
    %0 = vector.load %arg1[%c0, %c0_0] : memref<1x2048xf32, #tpu.memory_space<vmem>>, vector<1x2048xf32>
    %c0_1 = arith.constant 0 : index
    %c0_2 = arith.constant 0 : index
    %1 = vector.load %arg2[%c0_1, %c0_2] : memref<1x2048xf32, #tpu.memory_space<vmem>>, vector<1x2048xf32>
    tpu.vector_store %arg2[%c0_1, %c0_2], %0 {strides = array<i32>} : memref<1x2048xf32, #tpu.memory_space<vmem>>, vector<1x2048xf32>,
    return
  }
  func.func @transform_0(%arg0: i32) -> (i32, i32) {
    %c0_i32 = arith.constant 0 : i32
    %c0_i32_0 = arith.constant 0 : i32
    return %arg0, %c0_i32 : i32, i32
  }
  func.func @transform_1(%arg0: i32) -> (i32, i32) {
    %c0_i32 = arith.constant 0 : i32
    %c0_i32_0 = arith.constant 0 : i32
    return %arg0, %c0_i32 : i32, i32
  }
}

</mosaic_0001>

<bundles_post_ra>
// kernel: tpu_custom_call.1
= control target key start
LH: loop header
LB: loop body
LE: loop exit
PB: predicated region body
PF: predicated region fallthrough
CT: control target
= control target key end

     0   :  { %6 = vsyncpa [#allocation3], 0  ;;  %s104_s0 = inlined_call_operand.hbm [shape: f32[1,2048], index: 0, kind: input, shape index: {}]   ;;  %s105_s1 = inlined_call_operand.hbm [shape: f32[1,2048], index: 1, kind: output, shape index: {}]  }
   0x1   :  { %7 = vsyncpa [#allocation4], 0  ;;  %s86_s6 = smov [#allocation2]  }
   0x2   :  { %s14_s7 = sshll.u32 %s86_s6, 4  ;;  %s15_s7 = int_to_ptr.vmem [resolvable:$true] %s14_s7 }
   0x3   :  { %s50_s8 = scalar_lea.vmem %s15_s7, 256  ;;  %p55_p1 = scmp.lt.s32.totalorder %s15_s7, %s15_s7 }
   0x4   :  { %p51_p0 = scmp.ne.s32.totalorder %s15_s7, %s50_s8  ;;  %p56_p2 = scmp.lt.s32.totalorder %s50_s8, %s50_s8 }
   0x6   :  { %p57_p3 = por %p56_p2, %p55_p1 }
   0x8   :  { %p58_p4 = pnand %p57_p3, %p51_p0 }
   0xa   :  { %61 = shalt.err (!%p58_p4)
}
   0xb   :  { %17 = dma.hbm_to_vmem [thread:$0]  %s104_s0, 256, %s15_s7, [#allocation3]  }
   0xc   :  { %82 = dma.done.wait [#allocation3], 256  }
   0xd   :  { %83 = vsyncadd [#allocation3], 4294967040  ;;  %s87_s11 = smov [#allocation5]   ;;  %v21_v0 = vld [vmem:[#allocation2] sm:$0xff]  ;;  %v22_v1 = vld [vmem:[#allocation2 + $0x8] sm:$0xff] }
   0xe   :  { %s31_s12 = sshll.u32 %s87_s11, 4  ;;  %23 = vst [vmem:[#allocation5] sm:$0xff] %v21_v0  ;;  %24 = vst [vmem:[#allocation5 + $0x8] sm:$0xff] %v22_v1  ;;  %s32_s12 = int_to_ptr.vmem [resolvable:$true] %s31_s12 }
   0xf   :  { %s62_s13 = scalar_lea.vmem %s32_s12, 256  ;;  %p67_p6 = scmp.lt.s32.totalorder %s32_s12, %s32_s12 }
  0x10   :  { %p63_p5 = scmp.ne.s32.totalorder %s32_s12, %s62_s13  ;;  %p68_p7 = scmp.lt.s32.totalorder %s62_s13, %s62_s13 }
  0x12   :  { %p69_p8 = por %p68_p7, %p67_p6 }
  0x14   :  { %p70_p9 = pnand %p69_p8, %p63_p5 }
  0x16   :  { %73 = shalt.err (!%p70_p9)
}
  0x17   :  { %34 = dma.vmem_to_hbm [thread:$0]  %s32_s12, 256, %s105_s1, [#allocation4]  }
  0x18   :  { %84 = dma.done.wait [#allocation4], 256  }
  0x19   :  { %85 = vsyncadd [#allocation4], 4294967040 }
  0x1a   :  { %38 = vsyncpa [#allocation3], 1 }
  0x1b   :  { %39 = vsyncpa [#allocation4], 1 }

</bundles_post_ra>
